<compile_context>
chip_gen: v7x
topology: tpu7x:2x2x1
jax: 0.10.0
libtpu: 0.0.40
codegen_flags: <defaults>
</compile_context>

<pallas_src>
import functools

import jax
import jax.numpy as jnp
from jax.experimental import pallas as pl
from jax.experimental.pallas import tpu as pltpu


def _round_up(a: int, m: int) -> int:
    return (a + m - 1) // m * m


def _cdiv(a: int, b: int) -> int:
    return (a + b - 1) // b


def _linear_kernel(x_ref, w_ref, b_ref, out_ref):
    # One (batch-tile, n-tile): y = x @ W + b  (MXU matmul, f32 accumulate, VPU bias add)
    y = jnp.dot(x_ref[...], w_ref[...], preferred_element_type=jnp.float32)
    out_ref[...] = (y + b_ref[...]).astype(out_ref.dtype)


def prepare_params(weights, biases):
    """Pad parameters ONCE (not per forward call).

    weights: [input_dim, output_dim] -> [K_pad, N_pad] (K_pad multiple of 8 sublanes,
             N_pad multiple of 128 lanes), padded regions explicitly zero.
    biases:  [output_dim]            -> [1, N_pad], padded region explicitly zero.
    """
    K, N = weights.shape
    K_pad = _round_up(max(K, 1), 8)
    N_pad = _round_up(max(N, 1), 128)
    w_p = jnp.zeros((K_pad, N_pad), jnp.float32).at[:K, :N].set(weights.astype(jnp.float32))
    b_p = jnp.zeros((1, N_pad), jnp.float32).at[0, :N].set(biases.astype(jnp.float32))
    return w_p, b_p


def _plan_tiles(B: int, K_pad: int, N_pad: int,
                vmem_budget: int = 12 * 1024 * 1024,
                tile_b_cap: int = 2048,
                tile_n_cap: int = 512):
    """Static (Python-int) tile planning from static shapes."""
    # N tile: largest multiple of 128 <= tile_n_cap that divides N_pad.
    tile_n = 128
    for cand in range(128, min(N_pad, tile_n_cap) + 1, 128):
        if N_pad % cand == 0:
            tile_n = cand

    # VMEM footprint (all blocks double-buffered by default):
    #   W block: 2 * K_pad * tile_n * 4, b block: 2 * 8 * tile_n * 4 (sublane-padded),
    #   per batch row (x + out tiles): 2 * (K_pad + tile_n) * 4.
    resident = 2 * 4 * (K_pad * tile_n + 8 * tile_n)
    per_row = 2 * 4 * (K_pad + tile_n)
    max_rows = max(8, (vmem_budget - resident) // per_row)
    max_tile_b = min(tile_b_cap, (max_rows // 8) * 8)
    max_tile_b = max(max_tile_b, 8)

    B8 = _round_up(max(B, 1), 8)
    # Balanced batch tiles; give the "parallel" axis >= 2 real tiles for non-trivial
    # batches so v7x megacore sharding has work on both TensorCores.
    min_tiles = 2 if B8 >= 256 else 1
    n_b_tiles = max(_cdiv(B8, max_tile_b), min_tiles)
    tile_b = _round_up(_cdiv(B8, n_b_tiles), 8)
    n_b_tiles = _cdiv(B8, tile_b)
    B_pad = tile_b * n_b_tiles
    return tile_b, B_pad, tile_n


@functools.partial(jax.jit, static_argnames=("output_dim",))
def langevin_layer_forward(x, w_padded, b_padded, *, output_dim):
    """Forward pass of Langevin_Layer: torch.mm(x, weights) + biases.

    x:        [batch, input_dim] float32 (any leading shape; flattened like torch.mm)
    w_padded: [K_pad, N_pad] float32 (from prepare_params)
    b_padded: [1, N_pad]    float32 (from prepare_params)
    """
    K_pad, N_pad = w_padded.shape
    K = x.shape[-1]
    x2d = x.reshape(-1, K).astype(jnp.float32)
    B = x2d.shape[0]

    tile_b, B_pad, tile_n = _plan_tiles(B, K_pad, N_pad)

    # Pad x on batch (to B_pad) and contraction dim (to K_pad); zeros contribute 0.
    # This pad, the pallas_call, and the final slice all fuse under jit.
    x_p = jnp.pad(x2d, ((0, B_pad - B), (0, K_pad - K)))

    grid = (B_pad // tile_b, N_pad // tile_n)

    cost = pl.CostEstimate(
        flops=2 * B * K * output_dim,
        transcendentals=0,
        bytes_accessed=4 * (B * K + K * output_dim + output_dim + B * output_dim),
    )

    out_p = pl.pallas_call(
        _linear_kernel,
        out_shape=jax.ShapeDtypeStruct((B_pad, N_pad), jnp.float32),
        grid=grid,
        in_specs=[
            # x: one batch tile per i, full (padded) contraction dim.
            pl.BlockSpec((tile_b, K_pad), lambda i, j: (i, 0)),
            # W: constant over the batch axis (stays resident), tiled over N.
            pl.BlockSpec((K_pad, tile_n), lambda i, j: (0, j)),
            # b: one lane-tile row, constant over the batch axis.
            pl.BlockSpec((1, tile_n), lambda i, j: (0, j)),
        ],
        out_specs=pl.BlockSpec((tile_b, tile_n), lambda i, j: (i, j)),
        compiler_params=pltpu.CompilerParams(
            # Both axes are independent (no reduction axis): megacore-shardable on v7x,
            # harmless elsewhere.
            dimension_semantics=("parallel", "parallel"),
        ),
        cost_estimate=cost,
    )(x_p, w_padded, b_padded)

    # Strip batch / lane padding.
    return out_p[:B, :output_dim]


class LangevinLayer:
    """JAX/Pallas port of the PyTorch Langevin_Layer module."""

    def __init__(self, key, input_dim, output_dim):
        kw, kb = jax.random.split(key)
        self.input_dim = input_dim
        self.output_dim = output_dim
        # Same init distribution as the PyTorch module: U(-0.01, 0.01).
        self.weights = jax.random.uniform(kw, (input_dim, output_dim), jnp.float32, -0.01, 0.01)
        self.biases = jax.random.uniform(kb, (output_dim,), jnp.float32, -0.01, 0.01)
        # Pad once at init; forward never re-materializes W/b.
        self.w_padded, self.b_padded = prepare_params(self.weights, self.biases)

    def __call__(self, x):
        return langevin_layer_forward(x, self.w_padded, self.b_padded,
                                      output_dim=self.output_dim)


def _reference_forward(x, weights, biases):
    """Plain-JAX reference mirroring the PyTorch forward."""
    return x.reshape(-1, weights.shape[0]) @ weights + biases


if __name__ == "__main__":
    input_dim, output_dim = 4, 3

    key = jax.random.PRNGKey(0)
    k_params, k_x1, k_x2 = jax.random.split(key, 3)
    layer = LangevinLayer(k_params, input_dim, output_dim)

    # Small primary test (single batch tile).
    batch = 8
    x = jax.random.normal(k_x1, (batch, input_dim), jnp.float32)
    out = jax.block_until_ready(layer(x))
    ref = _reference_forward(x, layer.weights, layer.biases)
    assert out.shape == (batch, output_dim)
    assert jnp.allclose(out, ref, atol=1e-5, rtol=1e-5)

    # Secondary test: ragged batch exercising the balanced multi-tile path (2 x 304).
    batch2 = 600
    x2 = jax.random.normal(k_x2, (batch2, input_dim), jnp.float32)
    out2 = jax.block_until_ready(layer(x2))
    ref2 = _reference_forward(x2, layer.weights, layer.biases)
    assert out2.shape == (batch2, output_dim)
    assert jnp.allclose(out2, ref2, atol=1e-5, rtol=1e-5)

    print("KERNEL_OK")
</pallas_src>

<mosaic_0001>
module attributes {stable_mosaic.version = 11 : i64} {
  func.func @_linear_kernel(%arg0: i32, %arg1: i32, %arg2: memref<8x8xf32, #tpu.memory_space<vmem>>, %arg3: memref<8x128xf32, #tpu.memory_space<vmem>>, %arg4: memref<1x128xf32, #tpu.memory_space<vmem>>, %arg5: memref<8x128xf32, #tpu.memory_space<vmem>>) attributes {dimension_semantics = [#tpu.dimension_semantics<parallel>, #tpu.dimension_semantics<parallel>], iteration_bounds = array<i64: 1, 1>, scalar_prefetch = 0 : i64, scratch_operands = 0 : i64, tpu.core_type = #tpu.core_type<tc>, window_params = [{transform_indices = @transform_0, window_bounds = array<i64: 8, 8>}, {transform_indices = @transform_1, window_bounds = array<i64: 8, 128>}, {transform_indices = @transform_2, window_bounds = array<i64: 1, 128>}, {transform_indices = @transform_3, window_bounds = array<i64: 8, 128>}]} {
    %c0 = arith.constant 0 : index
    %c0_0 = arith.constant 0 : index
    %0 = vector.load %arg2[%c0, %c0_0] : memref<8x8xf32, #tpu.memory_space<vmem>>, vector<8x8xf32>
    %c0_1 = arith.constant 0 : index
    %c0_2 = arith.constant 0 : index
    %1 = vector.load %arg3[%c0_1, %c0_2] : memref<8x128xf32, #tpu.memory_space<vmem>>, vector<8x128xf32>
    %cst = arith.constant dense<0.000000e+00> : vector<8x128xf32>
    %2 = tpu.matmul %0, %1, %cst {dimension_numbers = #tpu.dot_dimension_numbers<[1], [0], [0], [1], [0, 0, 1, 1], [], []>} : vector<8x8xf32>, vector<8x128xf32>, vector<8x128xf32> -> vector<8x128xf32>
    %c0_3 = arith.constant 0 : index
    %c0_4 = arith.constant 0 : index
    %3 = vector.load %arg4[%c0_3, %c0_4] : memref<1x128xf32, #tpu.memory_space<vmem>>, vector<1x128xf32>
    %4 = vector.broadcast %3 : vector<1x128xf32> to vector<8x128xf32>
    %5 = arith.addf %2, %4 : vector<8x128xf32>
    %c0_5 = arith.constant 0 : index
    %c0_6 = arith.constant 0 : index
    %6 = vector.load %arg5[%c0_5, %c0_6] : memref<8x128xf32, #tpu.memory_space<vmem>>, vector<8x128xf32>
    tpu.vector_store %arg5[%c0_5, %c0_6], %5 {strides = array<i32>} : memref<8x128xf32, #tpu.memory_space<vmem>>, vector<8x128xf32>,
    return
  }
  func.func @transform_0(%arg0: i32, %arg1: i32) -> (i32, i32) {
    %c0_i32 = arith.constant 0 : i32
    %c0_i32_0 = arith.constant 0 : i32
    return %arg0, %c0_i32 : i32, i32
  }
  func.func @transform_1(%arg0: i32, %arg1: i32) -> (i32, i32) {
    %c0_i32 = arith.constant 0 : i32
    %c0_i32_0 = arith.constant 0 : i32
    return %c0_i32, %arg1 : i32, i32
  }
  func.func @transform_2(%arg0: i32, %arg1: i32) -> (i32, i32) {
    %c0_i32 = arith.constant 0 : i32
    %c0_i32_0 = arith.constant 0 : i32
    return %c0_i32, %arg1 : i32, i32
  }
  func.func @transform_3(%arg0: i32, %arg1: i32) -> (i32, i32) {
    %c0_i32 = arith.constant 0 : i32
    return %arg0, %arg1 : i32, i32
  }
}

</mosaic_0001>

<bundles_post_ra>
// kernel: langevin_layer_forward.1
= control target key start
LH: loop header
LB: loop body
LE: loop exit
PB: predicated region body
PF: predicated region fallthrough
CT: control target
= control target key end

     0   :  { %vm23_vm0 = vcmask 64512   ;;  %v113_v0 = vmov 0.0   ;;  %vm114_vm1 = vmmov 0   ;;  %s147_s1 = inlined_call_operand.vmem [shape: f32[8,128], index: 1, kind: input, shape index: {}]   ;;  %s148_s0 = inlined_call_operand.vmem [shape: f32[8,8], index: 0, kind: input, shape index: {}]   ;;  %s149_s2 = inlined_call_operand.vmem [shape: f32[1,128], index: 2, kind: input, shape index: {}]   ;;  %s150_s3 = inlined_call_operand.vmem [shape: f32[8,128], index: 3, kind: output, shape index: {}]  }
   0x1   :  { %106 = vmatprep.subr.mxu0 %v113_v0  ;;  %v15_v1 = vld [vmem:[%s147_s1] sm:$0xff]  ;;  %108 = vmatprep.mubr.msk.f32.mxu0 %vm114_vm1, %v113_v0 }
   0x2   :  { %v14_v2 = vld [vmem:[%s148_s0] sm:$0xff]  ;;  %107 = vmatpush3.msra.mxu0 %v15_v1 }
   0x3   :  { %109 = vmatmul.mubr.msk.f32.vlgmr.msra.gmra.mrb[0].mxu0 %vm23_vm0, %v14_v2  ;;  %v102_v3 = vld [vmem:[%s149_s2] ss:$0 sm:$0xff] }
  0xd6   :  { %v93_v4 = vpop.f32.mrb[0].mxu0 }
  0xd7   :  { %v94_v5 = vadd.f32 %v102_v3, %v93_v4  ;;  %v110_v6 = vpop.f32.mrb[1].mxu0 }
  0xd9   :  { %97 = vst [vmem:[%s150_s3] sm:$0xff] %v94_v5 }

</bundles_post_ra>
